<compile_context>
chip_gen: v6e
topology: v6e:2x2x1
jax: 0.10.0
libtpu: 0.0.40
codegen_flags: <defaults>
</compile_context>

<pallas_src>
import math
from functools import partial

import jax
import jax.numpy as jnp
import numpy as np
from jax.experimental import pallas as pl
from jax.experimental.pallas import tpu as pltpu


def _upconv_kernel(xa_ref, xh0_ref, xh1_ref, w_ref, b_ref, o_ref, xwin_ref):
    """Fused nearest-x2 upsample + 3x3 'same' conv for one row tile.

    xa_ref  : (TH, W+2, C)    body rows of the zero-padded ORIGINAL input
    xh0_ref : (1,  W+2, C)    halo row (padded row t*TH + TH)
    xh1_ref : (1,  W+2, C)    halo row (padded row t*TH + TH + 1)
    w_ref   : (9, C, 4*C)     folded sub-pixel weights [3*dh+dw, cin, (a,b,cout)]
    b_ref   : (1, 4*C)        f32 bias tiled over the 4 output parities
    o_ref   : (TH*W, 4*C)     raw GEMM block (decoded to NCHW in the wrapper)
    xwin_ref: (TH+2, W+2, C)  compute-dtype VMEM scratch for the halo window
    """
    TH, Wp2, C = xa_ref.shape
    W = Wp2 - 2
    cdt = xwin_ref.dtype

    # Assemble the (TH+2)-row halo window once (single cheap copy per step;
    # also casts f32 -> bf16 so the matmuls use the native bf16 MXU path).
    xwin_ref[0:TH, :, :] = xa_ref[...].astype(cdt)
    xwin_ref[TH:TH + 1, :, :] = xh0_ref[...].astype(cdt)
    xwin_ref[TH + 1:TH + 2, :, :] = xh1_ref[...].astype(cdt)

    # 9 accumulating MXU matmuls (K = C) over the folded taps; no materialized
    # 9x im2col patch, accumulation in f32.
    acc = None
    for dh in range(3):
        for dw in range(3):
            patch = xwin_ref[dh:dh + TH, dw:dw + W, :].reshape(TH * W, C)
            contrib = jnp.dot(patch, w_ref[3 * dh + dw],
                              preferred_element_type=jnp.float32)
            acc = contrib if acc is None else acc + contrib

    acc = acc + b_ref[...]                         # f32 bias, broadcast over rows
    o_ref[...] = acc.astype(o_ref.dtype)           # direct lane-dense store


def _fold_subpixel_weights(w_hwio):
    """Fold 3x3 HWIO conv weights into the sub-pixel (9, Cin, 4*Cout) matrix.

    Output pixel (2i+a, 2j+b) of conv3x3(upsample2x(x)) equals
        sum_{dh,dw,cin} Wbig[3*dh+dw, cin, (a,b,cout)] * xpad[i+dh, j+dw, cin]
    with xpad the 1-px zero-padded ORIGINAL image.  Fold is accumulated in f32.
    """
    kh_, kw_, c_in, c_out = w_hwio.shape
    assert (kh_, kw_) == (3, 3)
    w32 = w_hwio.astype(jnp.float32)
    # dmap[parity][tap] -> offset into the padded original image.
    dmap = ((0, 1, 1), (1, 1, 2))
    wbig = jnp.zeros((3, 3, 2, 2, c_in, c_out), jnp.float32)
    for a in range(2):
        for b in range(2):
            for kh in range(3):
                for kw in range(3):
                    wbig = wbig.at[dmap[a][kh], dmap[b][kw], a, b].add(w32[kh, kw])
    wbig = jnp.transpose(wbig, (0, 1, 4, 2, 3, 5))     # (dh, dw, cin, a, b, cout)
    return wbig.reshape(9, c_in, 4 * c_out)


def _step_vmem_bytes(TH, W, C, x_itemsize, c_itemsize):
    """Rough per-step VMEM working set (pipelined blocks + scratch + acc)."""
    window = (TH + 2) * (W + 2) * C * c_itemsize              # halo-window scratch
    inputs = 2 * (TH + 2) * (W + 2) * C * x_itemsize          # double-buffered input
    acc = TH * W * 4 * C * 4                                  # f32 accumulator
    out = 2 * TH * W * 4 * C * x_itemsize                     # double-buffered output
    weights = 2 * 36 * C * C * c_itemsize + 4 * 4 * C         # folded weights + bias
    return window + inputs + acc + out + weights


def _pick_tile_rows(H, W, C, x_itemsize, c_itemsize, budget=20 << 20):
    """Smallest row tile with M = W*TH >= 256 that fits the VMEM budget."""
    divisors = [d for d in range(1, H + 1)
                if H % d == 0 and ((W * d) % 8 == 0 or d == H)]
    fitting = [d for d in divisors
               if _step_vmem_bytes(d, W, C, x_itemsize, c_itemsize) <= budget]
    if not fitting:
        fitting = divisors[:1]
    big = [d for d in fitting if W * d >= 256]
    return big[0] if big else fitting[-1]


@partial(jax.jit, static_argnames=("upsample_type", "use_conv", "tile_rows",
                                   "compute_dtype"))
def upsample_block_forward(x_nchw, w_hwio, bias, *, upsample_type="interpolation",
                           use_conv=True, tile_rows=None,
                           compute_dtype=jnp.bfloat16):
    """Pallas implementation of UpSampleBlock.forward (interpolation path)."""
    assert upsample_type in ("interpolation", "transpose")
    # TODO(synk): 'transpose' upsample path (ConvTranspose2d stride=2) is not
    #             implemented; the module's default ('interpolation') path is.
    assert upsample_type == "interpolation"

    if not use_conv:
        return jnp.repeat(jnp.repeat(x_nchw, 2, axis=2), 2, axis=3)

    B, C, H, W = x_nchw.shape
    x_itemsize = x_nchw.dtype.itemsize
    c_itemsize = np.dtype(compute_dtype).itemsize

    TH = tile_rows if tile_rows is not None else _pick_tile_rows(
        H, W, C, x_itemsize, c_itemsize)
    assert H % TH == 0, "tile_rows must divide H"
    assert (W * TH) % 8 == 0 or TH == H, "W*tile_rows must be a multiple of 8"
    nT = H // TH

    # ---- cheap ORIGINAL-resolution prep (fused by XLA under jit) ----
    # NCHW -> NHWC, 1-px zero pad (= conv padding=1).  The x2 upsample is never
    # materialized, and there is no overlapping-tile copy of the input.
    xq = jnp.transpose(x_nchw, (0, 2, 3, 1))
    xq = jnp.pad(xq, ((0, 0), (1, 1), (1, 1), (0, 0)))     # (B, H+2, W+2, C)

    # Fold in f32, then a single cast to the MXU compute dtype (bf16).
    wbig = _fold_subpixel_weights(w_hwio).astype(compute_dtype)   # (9, C, 4C)
    bbig = jnp.tile(bias.astype(jnp.float32), 4).reshape(1, 4 * C)

    vmem_limit = int(min(64 << 20,
                         max(32 << 20,
                             2 * _step_vmem_bytes(TH, W, C,
                                                  x_itemsize, c_itemsize))))
    cost = pl.CostEstimate(
        flops=2 * 36 * B * H * W * C * C,
        transcendentals=0,
        bytes_accessed=((B * (H + 2) * (W + 2) * C + 4 * B * H * W * C)
                        * x_itemsize + 36 * C * C * c_itemsize))

    out_k = pl.pallas_call(
        _upconv_kernel,
        out_shape=jax.ShapeDtypeStruct((B, nT * TH * W, 4 * C), x_nchw.dtype),
        grid=(B, nT),
        in_specs=[
            # TH body rows of the padded input.
            pl.BlockSpec((None, TH, W + 2, C), lambda b, t: (b, t, 0, 0)),
            # The two halo rows just below the tile (single-row blocks, so no
            # parity constraint on TH and no wrapper-side halo-stack copy).
            pl.BlockSpec((None, 1, W + 2, C),
                         lambda b, t: (b, (t + 1) * TH, 0, 0)),
            pl.BlockSpec((None, 1, W + 2, C),
                         lambda b, t: (b, (t + 1) * TH + 1, 0, 0)),
            # Folded weights / bias: constant block index -> stays resident.
            pl.BlockSpec((9, C, 4 * C), lambda b, t: (0, 0, 0)),
            pl.BlockSpec((1, 4 * C), lambda b, t: (0, 0)),
        ],
        out_specs=pl.BlockSpec((None, TH * W, 4 * C), lambda b, t: (b, t, 0)),
        scratch_shapes=[pltpu.VMEM((TH + 2, W + 2, C), compute_dtype)],
        compiler_params=pltpu.CompilerParams(
            dimension_semantics=("parallel", "parallel"),
            vmem_limit_bytes=vmem_limit),
        cost_estimate=cost,
    )(xq, xq, xq, wbig, bbig)

    # Decode: rows (t, i, j), cols (a, b, c) -> NCHW (B, C, 2H, 2W).  The only
    # full-resolution wrapper op is this single transpose (NCHW interface).
    out = out_k.reshape(B, nT, TH, W, 2, 2, C)
    out = jnp.transpose(out, (0, 6, 1, 2, 4, 3, 5))        # (B, C, nT, TH, 2, W, 2)
    return out.reshape(B, C, 2 * H, 2 * W)


def _reference(x_nchw, w_hwio, bias):
    """Pure-JAX reference: nearest x2 upsample + 3x3 'same' conv (full f32)."""
    x = jnp.repeat(jnp.repeat(x_nchw, 2, axis=2), 2, axis=3)
    out = jax.lax.conv_general_dilated(
        x, w_hwio, window_strides=(1, 1), padding="SAME",
        dimension_numbers=("NCHW", "HWIO", "NCHW"),
        precision=jax.lax.Precision.HIGHEST)
    return out + bias.reshape(1, -1, 1, 1)


def _init_params(key, channels):
    """Deterministic init mimicking nn.Conv2d defaults (kaiming-uniform bounds)."""
    kw_key, kb_key = jax.random.split(key)
    fan_in = channels * 3 * 3
    bound = 1.0 / math.sqrt(fan_in)
    w = jax.random.uniform(kw_key, (3, 3, channels, channels),
                           minval=-bound, maxval=bound, dtype=jnp.float32)
    b = jax.random.uniform(kb_key, (channels,),
                           minval=-bound, maxval=bound, dtype=jnp.float32)
    return w, b


if __name__ == "__main__":
    key = jax.random.PRNGKey(0)
    k_x, k_p = jax.random.split(key)

    B, C, H, W = 2, 4, 16, 16
    x = jax.random.normal(k_x, (B, C, H, W), dtype=jnp.float32)
    w, b = _init_params(k_p, C)

    ref = np.asarray(jax.block_until_ready(_reference(x, w, b)))

    # Forced multi-row-tile run: exercises the halo-row BlockSpecs (nT = 4).
    out_tiled = jax.block_until_ready(upsample_block_forward(x, w, b, tile_rows=4))
    assert out_tiled.shape == (B, C, 2 * H, 2 * W), out_tiled.shape
    np.testing.assert_allclose(np.asarray(out_tiled), ref, rtol=5e-2, atol=5e-2)

    # Default configuration (auto tile selection, bf16 MXU compute).
    out = jax.block_until_ready(upsample_block_forward(x, w, b))
    assert out.shape == (B, C, 2 * H, 2 * W), out.shape
    np.testing.assert_allclose(np.asarray(out), ref, rtol=5e-2, atol=5e-2)

    print("KERNEL_OK")
</pallas_src>

<mosaic_0001>
module attributes {stable_mosaic.version = 11 : i64} {
  func.func @_upconv_kernel(%arg0: i32, %arg1: i32, %arg2: memref<1x4x18x4xf32, #tpu.memory_space<vmem>>, %arg3: memref<1x1x18x4xf32, #tpu.memory_space<vmem>>, %arg4: memref<1x1x18x4xf32, #tpu.memory_space<vmem>>, %arg5: memref<9x4x16xbf16, #tpu.memory_space<vmem>>, %arg6: memref<1x16xf32, #tpu.memory_space<vmem>>, %arg7: memref<1x64x16xf32, #tpu.memory_space<vmem>>, %arg8: memref<6x18x4xbf16, #tpu.memory_space<vmem>>) attributes {dimension_semantics = [#tpu.dimension_semantics<parallel>, #tpu.dimension_semantics<parallel>], iteration_bounds = array<i64: 2, 4>, scalar_prefetch = 0 : i64, scratch_operands = 1 : i64, tpu.core_type = #tpu.core_type<tc>, window_params = [{transform_indices = @transform_0, window_bounds = array<i64: 1, 4, 18, 4>}, {transform_indices = @transform_1, window_bounds = array<i64: 1, 1, 18, 4>}, {transform_indices = @transform_2, window_bounds = array<i64: 1, 1, 18, 4>}, {pipeline_mode = #tpu.pipeline_mode<synchronous>, transform_indices = @transform_3, window_bounds = array<i64: 9, 4, 16>}, {pipeline_mode = #tpu.pipeline_mode<synchronous>, transform_indices = @transform_4, window_bounds = array<i64: 1, 16>}, {transform_indices = @transform_5, window_bounds = array<i64: 1, 64, 16>}]} {
    %c0 = arith.constant 0 : index
    %c0_0 = arith.constant 0 : index
    %c0_1 = arith.constant 0 : index
    %c0_2 = arith.constant 0 : index
    %0 = vector.load %arg2[%c0, %c0_0, %c0_1, %c0_2] : memref<1x4x18x4xf32, #tpu.memory_space<vmem>>, vector<1x4x18x4xf32>
    %1 = vector.shape_cast %0 : vector<1x4x18x4xf32> to vector<4x18x4xf32>
    %2 = arith.truncf %1 : vector<4x18x4xf32> to vector<4x18x4xbf16>
    %c0_3 = arith.constant 0 : index
    %c0_4 = arith.constant 0 : index
    %c0_5 = arith.constant 0 : index
    %3 = vector.load %arg8[%c0_3, %c0_4, %c0_5] : memref<6x18x4xbf16, #tpu.memory_space<vmem>>, vector<4x18x4xbf16>
    tpu.vector_store %arg8[%c0_3, %c0_4, %c0_5], %2 {strides = array<i32>} : memref<6x18x4xbf16, #tpu.memory_space<vmem>>, vector<4x18x4xbf16>,
    %c0_6 = arith.constant 0 : index
    %c0_7 = arith.constant 0 : index
    %c0_8 = arith.constant 0 : index
    %c0_9 = arith.constant 0 : index
    %4 = vector.load %arg3[%c0_6, %c0_7, %c0_8, %c0_9] : memref<1x1x18x4xf32, #tpu.memory_space<vmem>>, vector<1x1x18x4xf32>
    %5 = vector.shape_cast %4 : vector<1x1x18x4xf32> to vector<1x18x4xf32>
    %6 = arith.truncf %5 : vector<1x18x4xf32> to vector<1x18x4xbf16>
    %c4 = arith.constant 4 : index
    %c0_10 = arith.constant 0 : index
    %c0_11 = arith.constant 0 : index
    %7 = vector.load %arg8[%c4, %c0_10, %c0_11] : memref<6x18x4xbf16, #tpu.memory_space<vmem>>, vector<1x18x4xbf16>
    tpu.vector_store %arg8[%c4, %c0_10, %c0_11], %6 {strides = array<i32>} : memref<6x18x4xbf16, #tpu.memory_space<vmem>>, vector<1x18x4xbf16>,
    %c0_12 = arith.constant 0 : index
    %c0_13 = arith.constant 0 : index
    %c0_14 = arith.constant 0 : index
    %c0_15 = arith.constant 0 : index
    %8 = vector.load %arg4[%c0_12, %c0_13, %c0_14, %c0_15] : memref<1x1x18x4xf32, #tpu.memory_space<vmem>>, vector<1x1x18x4xf32>
    %9 = vector.shape_cast %8 : vector<1x1x18x4xf32> to vector<1x18x4xf32>
    %10 = arith.truncf %9 : vector<1x18x4xf32> to vector<1x18x4xbf16>
    %c5 = arith.constant 5 : index
    %c0_16 = arith.constant 0 : index
    %c0_17 = arith.constant 0 : index
    %11 = vector.load %arg8[%c5, %c0_16, %c0_17] : memref<6x18x4xbf16, #tpu.memory_space<vmem>>, vector<1x18x4xbf16>
    tpu.vector_store %arg8[%c5, %c0_16, %c0_17], %10 {strides = array<i32>} : memref<6x18x4xbf16, #tpu.memory_space<vmem>>, vector<1x18x4xbf16>,
    %c0_18 = arith.constant 0 : index
    %c0_19 = arith.constant 0 : index
    %c0_20 = arith.constant 0 : index
    %12 = vector.load %arg8[%c0_18, %c0_19, %c0_20] : memref<6x18x4xbf16, #tpu.memory_space<vmem>>, vector<4x16x4xbf16>
    %13 = vector.shape_cast %12 : vector<4x16x4xbf16> to vector<64x4xbf16>
    %c0_21 = arith.constant 0 : index
    %c0_22 = arith.constant 0 : index
    %c0_23 = arith.constant 0 : index
    %14 = vector.load %arg5[%c0_21, %c0_22, %c0_23] : memref<9x4x16xbf16, #tpu.memory_space<vmem>>, vector<1x4x16xbf16>
    %15 = vector.shape_cast %14 : vector<1x4x16xbf16> to vector<4x16xbf16>
    %cst = arith.constant dense<0.000000e+00> : vector<64x16xf32>
    %16 = tpu.matmul %13, %15, %cst {dimension_numbers = #tpu.dot_dimension_numbers<[1], [0], [0], [1], [0, 0, 1, 1], [], []>} : vector<64x4xbf16>, vector<4x16xbf16>, vector<64x16xf32> -> vector<64x16xf32>
    %c0_24 = arith.constant 0 : index
    %c1 = arith.constant 1 : index
    %c0_25 = arith.constant 0 : index
    %17 = vector.load %arg8[%c0_24, %c1, %c0_25] : memref<6x18x4xbf16, #tpu.memory_space<vmem>>, vector<4x16x4xbf16>
    %18 = vector.shape_cast %17 : vector<4x16x4xbf16> to vector<64x4xbf16>
    %c1_26 = arith.constant 1 : index
    %c0_27 = arith.constant 0 : index
    %c0_28 = arith.constant 0 : index
    %19 = vector.load %arg5[%c1_26, %c0_27, %c0_28] : memref<9x4x16xbf16, #tpu.memory_space<vmem>>, vector<1x4x16xbf16>
    %20 = vector.shape_cast %19 : vector<1x4x16xbf16> to vector<4x16xbf16>
    %cst_29 = arith.constant dense<0.000000e+00> : vector<64x16xf32>
    %21 = tpu.matmul %18, %20, %cst_29 {dimension_numbers = #tpu.dot_dimension_numbers<[1], [0], [0], [1], [0, 0, 1, 1], [], []>} : vector<64x4xbf16>, vector<4x16xbf16>, vector<64x16xf32> -> vector<64x16xf32>
    %22 = arith.addf %16, %21 : vector<64x16xf32>
    %c0_30 = arith.constant 0 : index
    %c2 = arith.constant 2 : index
    %c0_31 = arith.constant 0 : index
    %23 = vector.load %arg8[%c0_30, %c2, %c0_31] : memref<6x18x4xbf16, #tpu.memory_space<vmem>>, vector<4x16x4xbf16>
    %24 = vector.shape_cast %23 : vector<4x16x4xbf16> to vector<64x4xbf16>
    %c2_32 = arith.constant 2 : index
    %c0_33 = arith.constant 0 : index
    %c0_34 = arith.constant 0 : index
    %25 = vector.load %arg5[%c2_32, %c0_33, %c0_34] : memref<9x4x16xbf16, #tpu.memory_space<vmem>>, vector<1x4x16xbf16>
    %26 = vector.shape_cast %25 : vector<1x4x16xbf16> to vector<4x16xbf16>
    %cst_35 = arith.constant dense<0.000000e+00> : vector<64x16xf32>
    %27 = tpu.matmul %24, %26, %cst_35 {dimension_numbers = #tpu.dot_dimension_numbers<[1], [0], [0], [1], [0, 0, 1, 1], [], []>} : vector<64x4xbf16>, vector<4x16xbf16>, vector<64x16xf32> -> vector<64x16xf32>
    %28 = arith.addf %22, %27 : vector<64x16xf32>
    %c1_36 = arith.constant 1 : index
    %c0_37 = arith.constant 0 : index
    %c0_38 = arith.constant 0 : index
    %29 = vector.load %arg8[%c1_36, %c0_37, %c0_38] : memref<6x18x4xbf16, #tpu.memory_space<vmem>>, vector<4x16x4xbf16>
    %30 = vector.shape_cast %29 : vector<4x16x4xbf16> to vector<64x4xbf16>
    %c3 = arith.constant 3 : index
    %c0_39 = arith.constant 0 : index
    %c0_40 = arith.constant 0 : index
    %31 = vector.load %arg5[%c3, %c0_39, %c0_40] : memref<9x4x16xbf16, #tpu.memory_space<vmem>>, vector<1x4x16xbf16>
    %32 = vector.shape_cast %31 : vector<1x4x16xbf16> to vector<4x16xbf16>
    %cst_41 = arith.constant dense<0.000000e+00> : vector<64x16xf32>
    %33 = tpu.matmul %30, %32, %cst_41 {dimension_numbers = #tpu.dot_dimension_numbers<[1], [0], [0], [1], [0, 0, 1, 1], [], []>} : vector<64x4xbf16>, vector<4x16xbf16>, vector<64x16xf32> -> vector<64x16xf32>
    %34 = arith.addf %28, %33 : vector<64x16xf32>
    %c1_42 = arith.constant 1 : index
    %c1_43 = arith.constant 1 : index
    %c0_44 = arith.constant 0 : index
    %35 = vector.load %arg8[%c1_42, %c1_43, %c0_44] : memref<6x18x4xbf16, #tpu.memory_space<vmem>>, vector<4x16x4xbf16>
    %36 = vector.shape_cast %35 : vector<4x16x4xbf16> to vector<64x4xbf16>
    %c4_45 = arith.constant 4 : index
    %c0_46 = arith.constant 0 : index
    %c0_47 = arith.constant 0 : index
    %37 = vector.load %arg5[%c4_45, %c0_46, %c0_47] : memref<9x4x16xbf16, #tpu.memory_space<vmem>>, vector<1x4x16xbf16>
    %38 = vector.shape_cast %37 : vector<1x4x16xbf16> to vector<4x16xbf16>
    %cst_48 = arith.constant dense<0.000000e+00> : vector<64x16xf32>
    %39 = tpu.matmul %36, %38, %cst_48 {dimension_numbers = #tpu.dot_dimension_numbers<[1], [0], [0], [1], [0, 0, 1, 1], [], []>} : vector<64x4xbf16>, vector<4x16xbf16>, vector<64x16xf32> -> vector<64x16xf32>
    %40 = arith.addf %34, %39 : vector<64x16xf32>
    %c1_49 = arith.constant 1 : index
    %c2_50 = arith.constant 2 : index
    %c0_51 = arith.constant 0 : index
    %41 = vector.load %arg8[%c1_49, %c2_50, %c0_51] : memref<6x18x4xbf16, #tpu.memory_space<vmem>>, vector<4x16x4xbf16>
    %42 = vector.shape_cast %41 : vector<4x16x4xbf16> to vector<64x4xbf16>
    %c5_52 = arith.constant 5 : index
    %c0_53 = arith.constant 0 : index
    %c0_54 = arith.constant 0 : index
    %43 = vector.load %arg5[%c5_52, %c0_53, %c0_54] : memref<9x4x16xbf16, #tpu.memory_space<vmem>>, vector<1x4x16xbf16>
    %44 = vector.shape_cast %43 : vector<1x4x16xbf16> to vector<4x16xbf16>
    %cst_55 = arith.constant dense<0.000000e+00> : vector<64x16xf32>
    %45 = tpu.matmul %42, %44, %cst_55 {dimension_numbers = #tpu.dot_dimension_numbers<[1], [0], [0], [1], [0, 0, 1, 1], [], []>} : vector<64x4xbf16>, vector<4x16xbf16>, vector<64x16xf32> -> vector<64x16xf32>
    %46 = arith.addf %40, %45 : vector<64x16xf32>
    %c2_56 = arith.constant 2 : index
    %c0_57 = arith.constant 0 : index
    %c0_58 = arith.constant 0 : index
    %47 = vector.load %arg8[%c2_56, %c0_57, %c0_58] : memref<6x18x4xbf16, #tpu.memory_space<vmem>>, vector<4x16x4xbf16>
    %48 = vector.shape_cast %47 : vector<4x16x4xbf16> to vector<64x4xbf16>
    %c6 = arith.constant 6 : index
    %c0_59 = arith.constant 0 : index
    %c0_60 = arith.constant 0 : index
    %49 = vector.load %arg5[%c6, %c0_59, %c0_60] : memref<9x4x16xbf16, #tpu.memory_space<vmem>>, vector<1x4x16xbf16>
    %50 = vector.shape_cast %49 : vector<1x4x16xbf16> to vector<4x16xbf16>
    %cst_61 = arith.constant dense<0.000000e+00> : vector<64x16xf32>
    %51 = tpu.matmul %48, %50, %cst_61 {dimension_numbers = #tpu.dot_dimension_numbers<[1], [0], [0], [1], [0, 0, 1, 1], [], []>} : vector<64x4xbf16>, vector<4x16xbf16>, vector<64x16xf32> -> vector<64x16xf32>
    %52 = arith.addf %46, %51 : vector<64x16xf32>
    %c2_62 = arith.constant 2 : index
    %c1_63 = arith.constant 1 : index
    %c0_64 = arith.constant 0 : index
    %53 = vector.load %arg8[%c2_62, %c1_63, %c0_64] : memref<6x18x4xbf16, #tpu.memory_space<vmem>>, vector<4x16x4xbf16>
    %54 = vector.shape_cast %53 : vector<4x16x4xbf16> to vector<64x4xbf16>
    %c7 = arith.constant 7 : index
    %c0_65 = arith.constant 0 : index
    %c0_66 = arith.constant 0 : index
    %55 = vector.load %arg5[%c7, %c0_65, %c0_66] : memref<9x4x16xbf16, #tpu.memory_space<vmem>>, vector<1x4x16xbf16>
    %56 = vector.shape_cast %55 : vector<1x4x16xbf16> to vector<4x16xbf16>
    %cst_67 = arith.constant dense<0.000000e+00> : vector<64x16xf32>
    %57 = tpu.matmul %54, %56, %cst_67 {dimension_numbers = #tpu.dot_dimension_numbers<[1], [0], [0], [1], [0, 0, 1, 1], [], []>} : vector<64x4xbf16>, vector<4x16xbf16>, vector<64x16xf32> -> vector<64x16xf32>
    %58 = arith.addf %52, %57 : vector<64x16xf32>
    %c2_68 = arith.constant 2 : index
    %c2_69 = arith.constant 2 : index
    %c0_70 = arith.constant 0 : index
    %59 = vector.load %arg8[%c2_68, %c2_69, %c0_70] : memref<6x18x4xbf16, #tpu.memory_space<vmem>>, vector<4x16x4xbf16>
    %60 = vector.shape_cast %59 : vector<4x16x4xbf16> to vector<64x4xbf16>
    %c8 = arith.constant 8 : index
    %c0_71 = arith.constant 0 : index
    %c0_72 = arith.constant 0 : index
    %61 = vector.load %arg5[%c8, %c0_71, %c0_72] : memref<9x4x16xbf16, #tpu.memory_space<vmem>>, vector<1x4x16xbf16>
    %62 = vector.shape_cast %61 : vector<1x4x16xbf16> to vector<4x16xbf16>
    %cst_73 = arith.constant dense<0.000000e+00> : vector<64x16xf32>
    %63 = tpu.matmul %60, %62, %cst_73 {dimension_numbers = #tpu.dot_dimension_numbers<[1], [0], [0], [1], [0, 0, 1, 1], [], []>} : vector<64x4xbf16>, vector<4x16xbf16>, vector<64x16xf32> -> vector<64x16xf32>
    %64 = arith.addf %58, %63 : vector<64x16xf32>
    %c0_74 = arith.constant 0 : index
    %c0_75 = arith.constant 0 : index
    %65 = vector.load %arg6[%c0_74, %c0_75] : memref<1x16xf32, #tpu.memory_space<vmem>>, vector<1x16xf32>
    %66 = vector.broadcast %65 : vector<1x16xf32> to vector<64x16xf32>
    %67 = arith.addf %64, %66 : vector<64x16xf32>
    %c0_76 = arith.constant 0 : index
    %c0_77 = arith.constant 0 : index
    %c0_78 = arith.constant 0 : index
    %68 = vector.load %arg7[%c0_76, %c0_77, %c0_78] : memref<1x64x16xf32, #tpu.memory_space<vmem>>, vector<1x64x16xf32>
    %69 = vector.shape_cast %68 : vector<1x64x16xf32> to vector<64x16xf32>
    %70 = vector.shape_cast %67 : vector<64x16xf32> to vector<1x64x16xf32>
    tpu.vector_store %arg7[%c0_76, %c0_77, %c0_78], %70 {strides = array<i32>} : memref<1x64x16xf32, #tpu.memory_space<vmem>>, vector<1x64x16xf32>,
    return
  }
  func.func @transform_0(%arg0: i32, %arg1: i32) -> (i32, i32, i32, i32) {
    %c0_i32 = arith.constant 0 : i32
    %c0_i32_0 = arith.constant 0 : i32
    %c0_i32_1 = arith.constant 0 : i32
    return %arg0, %arg1, %c0_i32, %c0_i32_0 : i32, i32, i32, i32
  }
  func.func @transform_1(%arg0: i32, %arg1: i32) -> (i32, i32, i32, i32) {
    %c1_i32 = arith.constant 1 : i32
    %0 = arith.addi %arg1, %c1_i32 : i32
    %c4_i32 = arith.constant 4 : i32
    %1 = arith.muli %0, %c4_i32 : i32
    %c0_i32 = arith.constant 0 : i32
    %c0_i32_0 = arith.constant 0 : i32
    %c0_i32_1 = arith.constant 0 : i32
    return %arg0, %1, %c0_i32, %c0_i32_0 : i32, i32, i32, i32
  }
  func.func @transform_2(%arg0: i32, %arg1: i32) -> (i32, i32, i32, i32) {
    %c1_i32 = arith.constant 1 : i32
    %0 = arith.addi %arg1, %c1_i32 : i32
    %c4_i32 = arith.constant 4 : i32
    %1 = arith.muli %0, %c4_i32 : i32
    %c1_i32_0 = arith.constant 1 : i32
    %2 = arith.addi %1, %c1_i32_0 : i32
    %c0_i32 = arith.constant 0 : i32
    %c0_i32_1 = arith.constant 0 : i32
    %c0_i32_2 = arith.constant 0 : i32
    return %arg0, %2, %c0_i32, %c0_i32_1 : i32, i32, i32, i32
  }
  func.func @transform_3(%arg0: i32, %arg1: i32) -> (i32, i32, i32) {
    %c0_i32 = arith.constant 0 : i32
    %c0_i32_0 = arith.constant 0 : i32
    %c0_i32_1 = arith.constant 0 : i32
    %c0_i32_2 = arith.constant 0 : i32
    return %c0_i32, %c0_i32_0, %c0_i32_1 : i32, i32, i32
  }
  func.func @transform_4(%arg0: i32, %arg1: i32) -> (i32, i32) {
    %c0_i32 = arith.constant 0 : i32
    %c0_i32_0 = arith.constant 0 : i32
    %c0_i32_1 = arith.constant 0 : i32
    return %c0_i32, %c0_i32_0 : i32, i32
  }
  func.func @transform_5(%arg0: i32, %arg1: i32) -> (i32, i32, i32) {
    %c0_i32 = arith.constant 0 : i32
    %c0_i32_0 = arith.constant 0 : i32
    return %arg0, %arg1, %c0_i32 : i32, i32, i32
  }
}

</mosaic_0001>

<bundles_post_ra>
// kernel: tile.8
= control target key start
LH: loop header
LB: loop body
LE: loop exit
PB: predicated region body
PF: predicated region fallthrough
CT: control target
= control target key end

     0   :  { %s22_s0 = inlined_call_operand.vmem [shape: f32[4], index: 0, kind: input, shape index: {}]   ;;  %s23_s1 = inlined_call_operand.vmem [shape: f32[4,4], index: 1, kind: output, shape index: {}]  }
   0x1   :  { %v4_v0 = vld [vmem:[%s22_s0] ss:$0 sm:$0xff] }
   0x2   :  { %5 = vst [vmem:[%s23_s1] sm:$0xf] %v4_v0 }

// kernel: tile.9
= control target key start
LH: loop header
LB: loop body
LE: loop exit
PB: predicated region body
PF: predicated region fallthrough
CT: control target
= control target key end

     0   :  { %vm8_vm0 = vcmask 31744   ;;  %s40_s8 = smov 4   ;;  %s41_s9 = smov 8   ;;  %vm14_vm1 = vcmask 130144   ;;  %vm20_vm2 = vcmask 97344   ;;  %vm26_vm3 = vcmask 64544   ;;  %s58_s0 = inlined_call_operand.vmem [shape: f32[4,4], index: 0, kind: input, shape index: {}]   ;;  %s59_s1 = inlined_call_operand.vmem [shape: f32[1,16], index: 1, kind: output, shape index: {}]  }
   0x1   :  { %v5_v0 = vld [vmem:[%s58_s0] sm:$0xf]  ;;  %s39_s0 = smov 12  }
   0x2   :  { %6 = vst [vmem:[#allocation1] sm:$0xf] %v5_v0 }
   0x9   :  { %v11_v1 = vld [vmem:[#allocation1 + $0x3] sm:$0x1]   ;;  %v23_v2 = vld [vmem:[#allocation1 + $0x1] sm:$0x1]   ;;  %v7_v3 = vld [vmem:[#allocation1] sm:$0x1]  }
   0xa   :  { %12 = vrot.lane.b32.xlu0 %v11_v1, %s39_s0  ;;  %24 = vrot.lane.b32.xlu1 %v23_v2, %s40_s8  ;;  %v17_v4 = vld [vmem:[#allocation1 + $0x2] sm:$0x1]   ;;  %9 = vst.msk [vmem:[#allocation0] sm:$0x1] %vm8_vm0, %v7_v3  }
   0xe   :  { %18 = vrot.lane.b32.xlu0 %v17_v4, %s41_s9 }
  0x7c   :  { %v13_v5 = vpop.permute.xlu0 %12   ;;  %v25_v6 = vpop.permute.xlu1 %24  }
  0x7d   :  { %15 = vst.msk [vmem:[#allocation0] sm:$0x1] %vm14_vm1, %v13_v5  }
  0x80   :  { %v19_v7 = vpop.permute.xlu0 %18  }
  0x81   :  { %21 = vst.msk [vmem:[#allocation0] sm:$0x1] %vm20_vm2, %v19_v7  }
  0x82   :  { %27 = vst.msk [vmem:[#allocation0] sm:$0x1] %vm26_vm3, %v25_v6  }
  0x89   :  { %v32_v8 = vld [vmem:[#allocation0] sm:$0x1] }
  0x8a   :  { %35 = vst [vmem:[%s59_s1] sm:$0x1] %v32_v8 }

// kernel: upsample_block_forward.1
= control target key start
LH: loop header
LB: loop body
LE: loop exit
PB: predicated region body
PF: predicated region fallthrough
CT: control target
= control target key end

     0   :  { %s2507_s18 = smov 0   ;;  %s2509_s19 = smov 0   ;;  %s3052_s0 = inlined_call_operand.vmem [shape: f32[2,18,18,4], index: 0, kind: input, shape index: {}, may-alias: {0,1,2}]   ;;  %s3053_s1 = inlined_call_operand.vmem [shape: f32[2,18,18,4], index: 1, kind: input, shape index: {}, may-alias: {0,1,2}]   ;;  %s3054_s2 = inlined_call_operand.vmem [shape: f32[2,18,18,4], index: 2, kind: input, shape index: {}, may-alias: {0,1,2}]   ;;  %s3055_s3 = inlined_call_operand.vmem [shape: bf16[9,4,16], index: 3, kind: input, shape index: {}]   ;;  %s3056_s4 = inlined_call_operand.vmem [shape: f32[1,16], index: 4, kind: input, shape index: {}]   ;;  %s3057_s5 = inlined_call_operand.vmem [shape: f32[2,256,16], index: 5, kind: output, shape index: {}]  }
   0x1   :  { %s2511_s20 = smov 0   ;;  %s2513_s21 = smov 0  }
   0x2   :  { %s2515_s22 = smov 0  }
   0x3 LB: > { %s24_s23 = sadd.s32 1, %s2467_s20  ;;  %s27_s24 = sadd.s32 1, %s2471_s21  ;;  %s2475_s22 = sphi %s2515_s22, %s15_s22   ;;  %s2471_s21 = sphi %s2513_s21, %s3066_s21   ;;  %s2467_s20 = sphi %s2511_s20, %s3065_s20   ;;  %s2463_s19 = sphi %s2509_s19, %s3064_s19   ;;  %s2459_s18 = sphi %s2507_s18, %s3063_s18  }
   0x4   : > { %p25_p0 = scmp.ge.s32.totalorder %s24_s23, 4  ;;  %p2084_p1 = scmp.ge.s32.totalorder %s2475_s22, 1 }
   0x5   : > { %p271_p2 = scmp.lt.s32.totalorder %s2475_s22, 9 }
   0x6   : > { %s3068_s23 = smov (%p25_p0, %s24_s23), 0  ;;  %s3070_s24 = smov (!%p25_p0, %s27_s24), %s2471_s21 }
   0x7   : > { %p272_p3 = pnand %p2084_p1, %p271_p2  ;;  %p29_p4 = scmp.ge.s32.totalorder %s3070_s24, 2 }
   0x8   : > { %s2085_s27 = sshll.u32 (!%p272_p3), %s2459_s18, 2  ;;  %p342_p5 = scmp.lt.s32.totalorder (!%p272_p3), %s2463_s19, 1 }
   0x9   : > { %s3072_s24 = smov (%p29_p4, %s3070_s24), 0  ;;  %275 = sbr.rel (%p272_p3) target bundleno = 329 (0x149), region = 40 }
   0xa   : > { %p344_p6 = scmp.lt.s32.totalorder (!%p272_p3), %s2085_s27, 17  ;;  %s2216_s10 = sadd.s32 (!%p272_p3), 4, %s2085_s27 }
   0xb   : > { %p361_p7 = scmp.lt.s32.totalorder (!%p272_p3), %s2216_s10, 17  ;;  %s372_s12 = sadd.s32 (!%p272_p3), 1, %s2216_s10 }
   0xc   : > { %p2566_p8 = scmp.lt.s32.totalorder (!%p272_p3), %s372_s12, 17 }
   0xe   : > { %v2112_v0 = vld [vmem:[%s3055_s3 + $0x2] sm:$0x3]  ;;  %vm653_vm0 = vcmask 1041408   ;;  %s3074_s19 = smov (!%p342_p5, %s2463_s19), 1  ;;  %v2551_v2 = vld [vmem:[%s3055_s3] sm:$0x3] }
   0xf   : > { %2375 = vmatprep.subr.msk.bf16.mxu1 %vm653_vm0, %v2112_v0  ;;  %2374 = vmatprep.subr.msk.bf16.mxu0 %vm653_vm0, %v2112_v0  ;;  %v655_v1 = vsel %vm653_vm0, %v2112_v0, 0  ;;  %s345_s30 = scalar_select %p344_p6, %s2085_s27, 17  ;;  %v2558_v3 = vld [vmem:[%s3055_s3 + $0x4] sm:$0x3]  ;;  %vm460_vm1 = vcmask 27648   ;;  %vm463_vm2 = vcmask 24576  }
  0x10   : > { %2373 = vmatpush3.bf16.msra.mxu1 %v655_v1  ;;  %2283 = vmatpush3.bf16.msra.mxu0 %v655_v1  ;;  %s2561_s8 = smul.u32 54, %s3074_s19  ;;  %s3076_s10 = smov (!%p361_p7, %s2216_s10), 17  ;;  %vm527_vm3 = vsmask.f32 3328  ;;  %v2594_v28 = vld [vmem:[%s3055_s3 + $0x6] sm:$0x3] }
  0x11   : > { %2376 = vmatprep.subr.msk.bf16.mxu1 %vm653_vm0, %v2551_v2  ;;  %2377 = vmatprep.subr.msk.bf16.mxu0 %vm653_vm0, %v2558_v3  ;;  %s2384_s9 = smul.u32 3, %s345_s30  ;;  %s3078_s12 = smov (!%p2566_p8, %s372_s12), 17  ;;  %vm528_vm4 = vsmask.f32 7440  ;;  %v2603_v29 = vld [vmem:[%s3055_s3 + $0x8] sm:$0x3] }
  0x12   : > { %s2386_s25 = smul.u32 3, %s3076_s10  ;;  %v2610_v30 = vsel %vm653_vm0, %v2551_v2, 0  ;;  %v2614_v31 = vsel %vm653_vm0, %v2558_v3, 0  ;;  %v2621_v35 = vsel %vm653_vm0, %v2594_v28, 0  ;;  %v2625_v42 = vsel %vm653_vm0, %v2603_v29, 0  ;;  %vm2664_vm8 = vmor %vm527_vm3, %vm528_vm4 }
  0x13   : > { %s348_s11 = sadd.s32 %s2561_s8, %s2384_s9  ;;  %s2387_s26 = smul.u32 3, %s3078_s12  ;;  %vm640_vm5 = vcmask 31744   ;;  %vm834_vm6 = vcmask 1042432   ;;  %vm835_vm7 = vcmask 1046532   ;;  %vm1932_vm10 = vcmask 130048  }
  0x14   : > { %s2086_s13 = sshll.u32 %s348_s11, 3  ;;  %s365_s27 = sadd.s32 %s2386_s25, %s2561_s8  ;;  %vm2699_vm9 = vmor %vm834_vm6, %vm835_vm7 }
  0x15   : > { %s350_s17 = scalar_lea.vmem %s3052_s0, %s2086_s13  ;;  %s2088_s30 = sshll.u32 %s365_s27, 3 }
  0x16   : > { %v396_v4 = vld [vmem:[%s350_s17] sm:$0xff]  ;;  %v397_v5 = vld [vmem:[%s350_s17 + $0x8] sm:$0xff]  ;;  %v398_v6 = vld [vmem:[%s350_s17 + $0x10] sm:$0x3]  ;;  %s379_s6 = sadd.s32 %s2387_s26, %s2561_s8  ;;  %s367_s12 = scalar_lea.vmem %s3053_s1, %s2088_s30 }
  0x17   : > { %v2219_v7 = vpack.c.bf16 %v396_v4, %v396_v4  ;;  %v2220_v8 = vpack.c.bf16 %v397_v5, %v397_v5  ;;  %v2221_v9 = vpack.c.bf16 %v398_v6, %v398_v6  ;;  %v402_v10 = vld [vmem:[%s350_s17 + $0x30] sm:$0xff]  ;;  %v403_v11 = vld [vmem:[%s350_s17 + $0x38] sm:$0xff]  ;;  %v404_v12 = vld [vmem:[%s350_s17 + $0x40] sm:$0x3]  ;;  %s2090_s13 = sshll.u32 %s379_s6, 3  ;;  %s2091_s6 = sshll.u32 %s2459_s18, 3 }
  0x18   : > { %v2225_v13 = vpack.c.bf16 %v402_v10, %v402_v10  ;;  %v2226_v14 = vpack.c.bf16 %v403_v11, %v403_v11  ;;  %v2227_v15 = vpack.c.bf16 %v404_v12, %v404_v12  ;;  %v399_v16 = vld [vmem:[%s350_s17 + $0x18] sm:$0xff]  ;;  %v400_v17 = vld [vmem:[%s350_s17 + $0x20] sm:$0xff]  ;;  %v401_v18 = vld [vmem:[%s350_s17 + $0x28] sm:$0x3]  ;;  %s381_s15 = scalar_lea.vmem %s3054_s2, %s2090_s13  ;;  %p388_p9 = scmp.lt.s32.totalorder %s2091_s6, 31 }
  0x19   : > { %461 = vst.msk [vmem:[#allocation2] sm:$0xf] %vm460_vm1, %v2219_v7  ;;  %462 = vst.msk [vmem:[#allocation2 + $0x4] sm:$0xf] %vm460_vm1, %v2220_v8  ;;  %v2222_v19 = vpack.c.bf16 %v399_v16, %v399_v16  ;;  %v2223_v20 = vpack.c.bf16 %v400_v17, %v400_v17  ;;  %v2224_v21 = vpack.c.bf16 %v401_v18, %v401_v18  ;;  %v405_v22 = vld [vmem:[%s350_s17 + $0x48] sm:$0xff]  ;;  %v406_v23 = vld [vmem:[%s350_s17 + $0x50] sm:$0xff] }
  0x1a   : > { %464 = vst.msk [vmem:[#allocation2 + $0x8] sm:$0x1] %vm463_vm2, %v2221_v9  ;;  %v407_v24 = vld [vmem:[%s350_s17 + $0x58] sm:$0x3]  ;;  %470 = vst.msk [vmem:[#allocation2 + $0x20] sm:$0x1] %vm463_vm2, %v2227_v15  ;;  %v2228_v25 = vpack.c.bf16 %v405_v22, %v405_v22  ;;  %v2229_v26 = vpack.c.bf16 %v406_v23, %v406_v23 }
  0x1b   : > { %468 = vst.msk [vmem:[#allocation2 + $0x18] sm:$0xf] %vm460_vm1, %v2225_v13  ;;  %469 = vst.msk [vmem:[#allocation2 + $0x1c] sm:$0xf] %vm460_vm1, %v2226_v14  ;;  %v2230_v27 = vpack.c.bf16 %v407_v24, %v407_v24  ;;  %v474_v32 = vld [vmem:[%s367_s12] sm:$0xff]  ;;  %v475_v33 = vld [vmem:[%s367_s12 + $0x8] sm:$0xff] }
  0x1c   : > { %465 = vst.msk [vmem:[#allocation2 + $0xc] sm:$0xf] %vm460_vm1, %v2222_v19  ;;  %466 = vst.msk [vmem:[#allocation2 + $0x10] sm:$0xf] %vm460_vm1, %v2223_v20  ;;  %v476_v34 = vld [vmem:[%s367_s12 + $0x10] sm:$0x3]  ;;  %v2231_v36 = vpack.c.bf16 %v474_v32, %v474_v32  ;;  %v2232_v37 = vpack.c.bf16 %v475_v33, %v475_v33 }
  0x1d   : > { %467 = vst.msk [vmem:[#allocation2 + $0x14] sm:$0x1] %vm463_vm2, %v2224_v21  ;;  %473 = vst.msk [vmem:[#allocation2 + $0x2c] sm:$0x1] %vm463_vm2, %v2230_v27  ;;  %v2233_v38 = vpack.c.bf16 %v476_v34, %v476_v34  ;;  %v494_v39 = vld [vmem:[%s381_s15] sm:$0xff]  ;;  %v495_v40 = vld [vmem:[%s381_s15 + $0x8] sm:$0xff] }
  0x1e   : > { %471 = vst.msk [vmem:[#allocation2 + $0x24] sm:$0xf] %vm460_vm1, %v2228_v25  ;;  %472 = vst.msk [vmem:[#allocation2 + $0x28] sm:$0xf] %vm460_vm1, %v2229_v26  ;;  %v496_v41 = vld [vmem:[%s381_s15 + $0x10] sm:$0x3]  ;;  %v2234_v43 = vpack.c.bf16 %v494_v39, %v494_v39  ;;  %v2235_v44 = vpack.c.bf16 %v495_v40, %v495_v40 }
  0x1f   : > { %v2236_v45 = vpack.c.bf16 %v496_v41, %v496_v41  ;;  %491 = vst.msk [vmem:[#allocation2 + $0x30] sm:$0xf] %vm460_vm1, %v2231_v36  ;;  %492 = vst.msk [vmem:[#allocation2 + $0x34] sm:$0xf] %vm460_vm1, %v2232_v37  ;;  %s3080_s6 = smov (!%p388_p9, %s2091_s6), 31  ;;  %s2092_s18 = sshll.u32 %s3074_s19, 5 }
  0x20   : > { %v2627_v46 = vld [vmem:[#allocation2] sm:$0xf]  ;;  %v2629_v47 = vld [vmem:[#allocation2 + $0x4] sm:$0xf]  ;;  %493 = vst.msk [vmem:[#allocation2 + $0x38] sm:$0x1] %vm463_vm2, %v2233_v38  ;;  %s391_s7 = sadd.s32 %s2092_s18, %s3080_s6 }
  0x21   : > { %v2631_v48 = vld [vmem:[#allocation2 + $0x8] sm:$0x1]  ;;  %v531_v49 = vshrl.u32 %v2627_v46, 16  ;;  %v534_v50 = vshll.u32 %v2627_v46, 16  ;;  %v540_v51 = vshll.u32 %v2629_v47, 16  ;;  %v544_v52 = vshrl.u32 %v2629_v47, 16 }
  0x22   : > { %v2640_v53 = vld [vmem:[#allocation2 + $0x18] sm:$0xf]  ;;  %511 = vst.msk [vmem:[#allocation2 + $0x3c] sm:$0xf] %vm460_vm1, %v2234_v43  ;;  %512 = vst.msk [vmem:[#allocation2 + $0x40] sm:$0xf] %vm460_vm1, %v2235_v44  ;;  %v2121_v58 = vcombine.low %v2627_v46, %v2629_v47 }
  0x23   : > { %513 = vst.msk [vmem:[#allocation2 + $0x44] sm:$0x1] %vm463_vm2, %v2236_v45  ;;  %v550_v54 = vshll.u32 %v2631_v48, 16  ;;  %v842_v55 = vrot.slane %v2631_v48, 5  ;;  %v2647_v56 = vld [vmem:[#allocation2 + $0x1c] sm:$0xf] }
  0x24   : > { %v2649_v57 = vld [vmem:[#allocation2 + $0x20] sm:$0x1]  ;;  %v533_v59 = vrot.slane %v531_v49, 4  ;;  %v536_v60 = vrot.slane %v534_v50, 5  ;;  %v542_v61 = vrot.slane %v540_v51, 5  ;;  %v546_v62 = vrot.slane %v544_v52, 4 }
  0x25   : > { %v552_v63 = vrot.slane %v550_v54, 5  ;;  %v579_v0 = vshrl.u32 %v2640_v53, 16  ;;  %v582_v1 = vshll.u32 %v2640_v53, 16  ;;  %v588_v2 = vshll.u32 %v2647_v56, 16  ;;  %v2658_v7 = vld [vmem:[#allocation2 + $0xc] sm:$0xf] }
  0x26   : > { %v537_v3 = vor.u32 %v536_v60, %v533_v59  ;;  %v547_v4 = vor.u32 %v546_v62, %v542_v61  ;;  %v592_v5 = vshrl.u32 %v2647_v56, 16  ;;  %v598_v6 = vshll.u32 %v2649_v57, 16  ;;  %v2660_v8 = vld [vmem:[#allocation2 + $0x10] sm:$0xf]  ;;  %v2669_v19 = vld [vmem:[#allocation2 + $0x14] sm:$0x1] }
  0x27   : > { %v581_v10 = vrot.slane %v579_v0, 4  ;;  %v584_v11 = vrot.slane %v582_v1, 5  ;;  %v590_v12 = vrot.slane %v588_v2, 5  ;;  %v856_v13 = vrot.slane %v2649_v57, 5  ;;  %v2679_v27 = vld [vmem:[#allocation2 + $0x24] sm:$0xf] }
  0x28   : > { %v538_v14 = vrot.slane %v537_v3, 4  ;;  %v548_v15 = vrot.slane %v547_v4, 4  ;;  %v594_v16 = vrot.slane %v592_v5, 4  ;;  %v600_v17 = vrot.slane %v598_v6, 5  ;;  %v2681_v37 = vld [vmem:[#allocation2 + $0x28] sm:$0xf] }
  0x29   : > { %v585_v18 = vor.u32 %v584_v11, %v581_v10  ;;  %v555_v20 = vshrl.u32 %v2658_v7, 16  ;;  %v558_v21 = vshll.u32 %v2658_v7, 16  ;;  %v564_v22 = vshll.u32 %v2660_v8, 16  ;;  %v2688_v49 = vld [vmem:[#allocation2 + $0x2c] sm:$0x1]  ;;  %s2093_s19 = sshll.u32 %s391_s7, 3 }
  0x2a   : > { %v543_v23 = vsel %vm2664_vm8, %v538_v14, %v542_v61  ;;  %v553_v24 = vsel %vm2664_vm8, %v548_v15, %v552_v63  ;;  %v595_v25 = vor.u32 %v594_v16, %v590_v12  ;;  %v568_v26 = vshrl.u32 %v2660_v8, 16  ;;  %v822_v60 = vld [vmem:[#allocation2] sm:$0xe]  ;;  %v823_v14 = vld [vmem:[#allocation2 + $0xc] sm:$0xe]  ;;  %s3013_s13 = scalar_lea.vmem %s3057_s5, %s2093_s19 }
  0x2b   : > { %v2113_v32 = vcombine.low %v543_v23, %v553_v24  ;;  %v586_v33 = vrot.slane %v585_v18, 4  ;;  %v557_v34 = vrot.slane %v555_v20, 4  ;;  %v560_v36 = vrot.slane %v558_v21, 5  ;;  %v824_v20 = vld [vmem:[#allocation2 + $0x18] sm:$0xe] }
  0x2c   : > { %v596_v38 = vrot.slane %v595_v25, 4  ;;  %v566_v39 = vrot.slane %v564_v22, 5  ;;  %v570_v40 = vrot.slane %v568_v26, 4  ;;  %v574_v41 = vshll.u32 %v2669_v19, 16 }
  0x2d   : > { %2284 = vmatprep.mubr.msk.bf16.mxu0 %vm640_vm5, %v2113_v32  ;;  %v591_v43 = vsel %vm2664_vm8, %v586_v33, %v590_v12  ;;  %v561_v44 = vor.u32 %v560_v36, %v557_v34  ;;  %v849_v45 = vrot.slane %v2669_v19, 5  ;;  %v603_v50 = vshrl.u32 %v2679_v27, 16  ;;  %v2759_v19 = vld [vmem:[%s3055_s3 + $0xc] sm:$0x3] }
  0x2e   : > { %v601_v51 = vsel %vm2664_vm8, %v596_v38, %v600_v17  ;;  %v571_v52 = vor.u32 %v570_v40, %v566_v39  ;;  %v576_v54 = vrot.slane %v574_v41, 5  ;;  %v606_v59 = vshll.u32 %v2679_v27, 16  ;;  %v825_v40 = vld [vmem:[#allocation2 + $0x24] sm:$0xe]  ;;  %v1086_v41 = vld [vmem:[#allocation2 + $0xc] sm:$0xf] }
  0x2f   : > { %v2115_v61 = vcombine.low %v591_v43, %v601_v51  ;;  %v562_v62 = vrot.slane %v561_v44, 4  ;;  %v605_v63 = vrot.slane %v603_v50, 4  ;;  %v612_v0 = vshll.u32 %v2681_v37, 16 }
  0x30   : > { %v572_v1 = vrot.slane %v571_v52, 4  ;;  %v608_v2 = vrot.slane %v606_v59, 5  ;;  %v616_v3 = vshrl.u32 %v2681_v37, 16  ;;  %v622_v4 = vshll.u32 %v2688_v49, 16  ;;  %v2733_v59 = vld [vmem:[#allocation2 + $0x10] sm:$0xf] }
  0x31   : > { %2288 = vmatprep.mubr.msk.bf16.mxu1 %vm640_vm5, %v2115_v61  ;;  %v567_v6 = vsel %vm2664_vm8, %v562_v62, %v566_v39  ;;  %v614_v10 = vrot.slane %v612_v0, 5  ;;  %v2129_v11 = vrot.slane %v822_v60, 9  ;;  %v839_v12 = vrot.slane %v2629_v47, 5  ;;  %v2735_v60 = vld [vmem:[#allocation2 + $0x14] sm:$0x1] }
  0x32   : > { %v577_v15 = vsel %vm2664_vm8, %v572_v1, %v576_v54  ;;  %v609_v16 = vor.u32 %v608_v2, %v605_v63  ;;  %v618_v17 = vrot.slane %v616_v3, 4  ;;  %v624_v18 = vrot.slane %v622_v4, 5  ;;  %v1089_v63 = vld [vmem:[#allocation2 + $0x18] sm:$0xf]  ;;  %v2750_v4 = vld [vmem:[#allocation2 + $0x1c] sm:$0xf] }
  0x33   : > { %v2114_v21 = vcombine.low %v567_v6, %v577_v15  ;;  %v840_v22 = vsel %vm2699_vm9, %v2129_v11, %v839_v12  ;;  %v841_v23 = vrot.slane %v839_v12, 4  ;;  %v2122_v24 = vcombine.low %v2658_v7, %v2660_v8  ;;  %v2754_v12 = vld [vmem:[#allocation2 + $0x20] sm:$0x1] }
  0x34   : > { %v610_v25 = vrot.slane %v609_v16, 4  ;;  %v619_v26 = vor.u32 %v618_v17, %v614_v10  ;;  %v2130_v32 = vrot.slane %v823_v14, 9  ;;  %v846_v33 = vrot.slane %v2660_v8, 5 }
  0x35   : > { %2285 = vmatmul.mubr.msk.bf16.vlgmr.msra.gmra.mxu0 %vm640_vm5, %v2114_v21  ;;  %v843_v34 = vsel %vm2699_vm9, %v841_v23, %v842_v55  ;;  %v2123_v36 = vcombine.low %v2640_v53, %v2647_v56  ;;  %v2131_v38 = vrot.slane %v824_v20, 9  ;;  %v853_v39 = vrot.slane %v2647_v56, 5  ;;  %v1092_v23 = vld [vmem:[#allocation2 + $0x24] sm:$0xf]  ;;  %v2815_v56 = vld [vmem:[#allocation2 + $0x38] sm:$0x1] }
  0x36   : > { %v615_v43 = vsel %vm2664_vm8, %v610_v25, %v614_v10  ;;  %v620_v44 = vrot.slane %v619_v26, 4  ;;  %2303 = vmatpush3.bf16.msra.mxu0 %v2614_v31  ;;  %v2134_v50 = vcombine.low %v840_v22, %v843_v34  ;;  %v847_v48 = vsel %vm2699_vm9, %v2130_v32, %v846_v33  ;;  %v2782_v34 = vld [vmem:[#allocation2 + $0x28] sm:$0xf] }
  0x37   : > { %v848_v51 = vrot.slane %v846_v33, 4  ;;  %2379 = vmatprep.subr.msk.bf16.mxu0 %vm653_vm0, %v2603_v29  ;;  %v854_v55 = vsel %vm2699_vm9, %v2131_v38, %v853_v39  ;;  %v855_v52 = vrot.slane %v853_v39, 4  ;;  %v2124_v54 = vcombine.low %v2679_v27, %v2681_v37 }
  0x38   : > { %v625_v31 = vsel %vm2664_vm8, %v620_v44, %v624_v18  ;;  %2304 = vmatprep.mubr.msk.bf16.mxu0 %vm640_vm5, %v2134_v50  ;;  %v2132_v61 = vrot.slane %v825_v40, 9  ;;  %v860_v62 = vrot.slane %v2681_v37, 5  ;;  %v863_v29 = vrot.slane %v2688_v49, 5  ;;  %v2789_v40 = vld [vmem:[#allocation2 + $0x2c] sm:$0x1] }
  0x39   : > { %v2116_v0 = vcombine.low %v615_v43, %v625_v31  ;;  %v850_v1 = vsel %vm2699_vm9, %v848_v51, %v849_v45  ;;  %v857_v2 = vsel %vm2699_vm9, %v855_v52, %v856_v13  ;;  %v1099_v3 = vshrl.u32 %v1086_v41, 16 }
  0x3a   : > { %v2135_v6 = vcombine.low %v847_v48, %v850_v1  ;;  %v2136_v10 = vcombine.low %v854_v55, %v857_v2  ;;  %v861_v49 = vsel %vm2699_vm9, %v2132_v61, %v860_v62  ;;  %v862_v11 = vrot.slane %v860_v62, 4  ;;  %v1095_v62 = vld [vmem:[#allocation2 + $0x30] sm:$0xf]  ;;  %v2801_v2 = vld [vmem:[#allocation2 + $0x34] sm:$0xf] }
  0x3b   : > { %2289 = vmatmul.mubr.msk.bf16.vlgmr.msra.gmra.mxu1 %vm640_vm5, %v2116_v0  ;;  %v1101_v57 = vrot.slane %v1099_v3, 4  ;;  %v1102_v13 = vshll.u32 %v1086_v41, 16  ;;  %v1108_v45 = vshll.u32 %v2733_v59, 16  ;;  %v1112_v14 = vshrl.u32 %v2733_v59, 16 }
  0x3c   : > { %2293 = vmatpush3.bf16.msra.mxu1 %v2610_v30  ;;  %2294 = vmatprep.mubr.msk.bf16.mxu1 %vm640_vm5, %v2121_v58  ;;  %v864_v15 = vsel %vm2699_vm9, %v862_v11, %v863_v29  ;;  %v1118_v16 = vshll.u32 %v2735_v60, 16  ;;  %v1123_v17 = vshrl.u32 %v1089_v63, 16  ;;  %v1126_v18 = vshll.u32 %v1089_v63, 16 }
  0x3d   : > { %2378 = vmatprep.subr.msk.bf16.mxu1 %vm653_vm0, %v2594_v28  ;;  %2305 = vmatmul.mubr.msk.bf16.vlgmr.msra.gmra.mxu0 %vm640_vm5, %v2135_v6  ;;  %v2137_v20 = vcombine.low %v861_v49, %v864_v15  ;;  %v1104_v21 = vrot.slane %v1102_v13, 5  ;;  %v1110_v30 = vrot.slane %v1108_v45, 5  ;;  %v1114_v22 = vrot.slane %v1112_v14, 4 }
  0x3e   : > { %2323 = vmatpush3.bf16.msra.mxu0 %v2625_v42  ;;  %2308 = vmatprep.mubr.msk.bf16.mxu0 %vm640_vm5, %v2136_v10  ;;  %v1120_v46 = vrot.slane %v1118_v16, 5  ;;  %v1125_v47 = vrot.slane %v1123_v17, 4  ;;  %v1128_v58 = vrot.slane %v1126_v18, 5  ;;  %v1132_v25 = vshll.u32 %v2750_v4, 16  ;;  %v2787_v42 = vld [vmem:[%s3055_s3 + $0xa] sm:$0x3] }
  0x3f   : > { %v1105_v26 = vor.u32 %v1104_v21, %v1101_v57  ;;  %v1115_v32 = vor.u32 %v1114_v22, %v1110_v30  ;;  %v1136_v28 = vshrl.u32 %v2750_v4, 16  ;;  %v1142_v33 = vshll.u32 %v2754_v12, 16  ;;  %2381 = vmatprep.subr.msk.bf16.mxu0 %vm653_vm0, %v2759_v19  ;;  %v2429_v16 = vld [vmem:[#allocation2 + $0xc] sm:$0xff]  }
  0x40   : > { %v1129_v38 = vor.u32 %v1128_v58, %v1125_v47  ;;  %v1134_v39 = vrot.slane %v1132_v25, 5  ;;  %v1147_v41 = vshrl.u32 %v1092_v23, 16  ;;  %v1150_v43 = vshll.u32 %v1092_v23, 16  ;;  %v1296_v58 = vld [vmem:[#allocation2 + $0xc] sm:$0xe] }
  0x41   : > { %v1106_v44 = vrot.slane %v1105_v26, 4  ;;  %v1116_v50 = vrot.slane %v1115_v32, 4  ;;  %v1138_v48 = vrot.slane %v1136_v28, 4  ;;  %v1144_v51 = vrot.slane %v1142_v33, 5 }
  0x42   : > { %v1130_v55 = vrot.slane %v1129_v38, 4  ;;  %v1149_v52 = vrot.slane %v1147_v41, 4  ;;  %v1152_v31 = vrot.slane %v1150_v43, 5  ;;  %v1156_v61 = vshll.u32 %v2782_v34, 16  ;;  %v1561_v41 = vld [vmem:[#allocation2 + $0x18] sm:$0xf] }
  0x43   : > { %2295 = vmatmul.mubr.msk.bf16.vlgmr.msra.gmra.mxu1 %vm640_vm5, %v2122_v24  ;;  %v1111_v29 = vsel %vm2664_vm8, %v1106_v44, %v1110_v30  ;;  %v1121_v63 = vsel %vm2664_vm8, %v1116_v50, %v1120_v46  ;;  %v1139_v0 = vor.u32 %v1138_v48, %v1134_v39  ;;  %v1160_v1 = vshrl.u32 %v2782_v34, 16  ;;  %v2430_v43 = vld [vmem:[#allocation2 + $0x18] sm:$0xff]  }
  0x44   : > { %2313 = vmatpush3.bf16.msra.mxu1 %v2621_v35  ;;  %2298 = vmatprep.mubr.msk.bf16.mxu1 %vm640_vm5, %v2123_v36  ;;  %v2152_v7 = vcombine.low %v1111_v29, %v1121_v63  ;;  %v1135_v8 = vsel %vm2664_vm8, %v1130_v55, %v1134_v39  ;;  %v1153_v24 = vor.u32 %v1152_v31, %v1149_v52  ;;  %v1158_v3 = vrot.slane %v1156_v61, 5  ;;  %v2431_v55 = vld [vmem:[#allocation2 + $0x24] sm:$0xff]  }
  0x45   : > { %2309 = vmatmul.mubr.msk.bf16.gmra.mxu0 %vm640_vm5, %v2137_v20  ;;  %2380 = vmatprep.subr.msk.bf16.mxu1 %vm653_vm0, %v2787_v42  ;;  %v1140_v6 = vrot.slane %v1139_v0, 4  ;;  %v1162_v10 = vrot.slane %v1160_v1, 4  ;;  %v1166_v35 = vshll.u32 %v2789_v40, 16  ;;  %v1171_v49 = vshrl.u32 %v1095_v62, 16  ;;  %v1298_v31 = vld [vmem:[#allocation2 + $0x24] sm:$0xe] }
  0x46   : > { %2324 = vmatprep.mubr.msk.bf16.mxu0 %vm640_vm5, %v2152_v7  ;;  %v1154_v53 = vrot.slane %v1153_v24, 4  ;;  %v1174_v36 = vshll.u32 %v1095_v62, 16  ;;  %v1180_v11 = vshll.u32 %v2801_v2, 16  ;;  %v1184_v57 = vshrl.u32 %v2801_v2, 16  ;;  %v2433_v1 = vld [vmem:[#allocation2 + $0x18] sm:$0xff]  }
  0x47   : > { %v1145_v13 = vsel %vm2664_vm8, %v1140_v6, %v1144_v51  ;;  %v1163_v45 = vor.u32 %v1162_v10, %v1158_v3  ;;  %v1168_v14 = vrot.slane %v1166_v35, 5  ;;  %v1173_v15 = vrot.slane %v1171_v49, 4  ;;  %v2846_v51 = vld [vmem:[#allocation2 + $0x1c] sm:$0xf]  ;;  %v1563_v49 = vld [vmem:[#allocation2 + $0x20] sm:$0x1] }
  0x48   : > { %v2153_v17 = vcombine.low %v1135_v8, %v1145_v13  ;;  %v1176_v18 = vrot.slane %v1174_v36, 5  ;;  %v1182_v20 = vrot.slane %v1180_v11, 5  ;;  %v1159_v21 = vsel %vm2664_vm8, %v1154_v53, %v1158_v3  ;;  %v2432_v13 = vld [vmem:[#allocation2 + $0x30] sm:$0xff]  }
  0x49   : > { %v1164_v30 = vrot.slane %v1163_v45, 4  ;;  %v1186_v22 = vrot.slane %v1184_v57, 4  ;;  %v1190_v23 = vshll.u32 %v2815_v56, 16  ;;  %v1486_v46 = vsel %vm653_vm0, %v2759_v19, 0  ;;  %v2195_v19 = vld [vmem:[%s3055_s3 + $0x10] sm:$0x3] }
  0x4a   : > { %v1177_v47 = vor.u32 %v1176_v18, %v1173_v15  ;;  %v1314_v28 = vrot.slane %v2733_v59, 5  ;;  %v2160_v37 = vrot.slane %v1296_v58, 9  ;;  %v1321_v39 = vrot.slane %v2750_v4, 5 }
  0x4b   : > { %2299 = vmatmul.mubr.msk.bf16.gmra.mxu1 %vm640_vm5, %v2124_v54  ;;  %v1169_v25 = vsel %vm2664_vm8, %v1164_v30, %v1168_v14  ;;  %v1187_v26 = vor.u32 %v1186_v22, %v1182_v20  ;;  %v1192_v32 = vrot.slane %v1190_v23, 5  ;;  %v1297_v54 = vld [vmem:[#allocation2 + $0x18] sm:$0xe]  ;;  %v1317_v48 = vrot.slane %v2735_v60, 5  ;;  %v2182_v60 = vld [vmem:[%s3055_s3 + $0xe] sm:$0x3] }
  0x4c   : > { %2314 = vmatprep.mubr.msk.bf16.mxu1 %vm640_vm5, %v2429_v16  ;;  %v2154_v33 = vcombine.low %v1159_v21, %v1169_v25  ;;  %v1178_v38 = vrot.slane %v1177_v47, 4  ;;  %v1316_v50 = vrot.slane %v1314_v28, 4  ;;  %v1367_v4 = vsel %vm653_vm0, %v2787_v42, 0  ;;  %v2887_v23 = vld [vmem:[#allocation2 + $0x28] sm:$0xf] }
  0x4d   : > { %2325 = vmatmul.mubr.msk.bf16.vlgmr.msra.gmra.mxu0 %vm640_vm5, %v2153_v17  ;;  %v1188_v27 = vrot.slane %v1187_v26, 4  ;;  %v2161_v52 = vrot.slane %v1297_v54, 9  ;;  %v1328_v61 = vrot.slane %v2782_v34, 5  ;;  %v1315_v29 = vsel %vm2699_vm9, %v2160_v37, %v1314_v28  ;;  %v1771_v17 = vld [vmem:[#allocation2 + $0x18] sm:$0xe]  ;;  %v2435_v28 = vld [vmem:[#allocation2 + $0x30] sm:$0xff]  }
  0x4e   : > { %2343 = vmatpush3.bf16.msra.mxu0 %v1486_v46  ;;  %2328 = vmatprep.mubr.msk.bf16.mxu0 %vm640_vm5, %v2154_v33  ;;  %v1183_v59 = vsel %vm2664_vm8, %v1178_v38, %v1182_v20  ;;  %v1323_v63 = vrot.slane %v1321_v39, 4  ;;  %v1574_v0 = vshrl.u32 %v1561_v41, 16  ;;  %v1324_v7 = vrot.slane %v2754_v12, 5  ;;  %v1299_v20 = vld [vmem:[#allocation2 + $0x30] sm:$0xe]  ;;  %v2434_v46 = vld [vmem:[#allocation2 + $0x24] sm:$0xff]  }
  0x4f   : > { %v1193_v44 = vsel %vm2664_vm8, %v1188_v27, %v1192_v32  ;;  %2383 = vmatprep.subr.msk.bf16.mxu0 %vm653_vm0, %v2195_v19  ;;  %v1577_v8 = vshll.u32 %v1561_v41, 16  ;;  %v1583_v42 = vshll.u32 %v2846_v51, 16  ;;  %v1587_v24 = vshrl.u32 %v2846_v51, 16 }
  0x50   : > { %v2155_v62 = vcombine.low %v1183_v59, %v1193_v44  ;;  %v1318_v34 = vsel %vm2699_vm9, %v1316_v50, %v1317_v48  ;;  %v2162_v3 = vrot.slane %v1298_v31, 9  ;;  %v1331_v6 = vrot.slane %v2789_v40, 5  ;;  %v1564_v40 = vld [vmem:[#allocation2 + $0x24] sm:$0xf]  ;;  %v2899_v59 = vld [vmem:[#allocation2 + $0x34] sm:$0xf] }
  0x51   : > { %v1576_v10 = vrot.slane %v1574_v0, 4  ;;  %v1330_v35 = vrot.slane %v1328_v61, 4  ;;  %v1579_v12 = vrot.slane %v1577_v8, 5  ;;  %v2864_v53 = vrot.slane %v1583_v42, 5 }
  0x52   : > { %v1589_v36 = vrot.slane %v1587_v24, 4  ;;  %v2869_v11 = vsel %vm653_vm0, %v2182_v60, 0  ;;  %v1789_v57 = vrot.slane %v2846_v51, 5  ;;  %v2165_v45 = vcombine.low %v1315_v29, %v1318_v34  ;;  %v1566_v51 = vld [vmem:[#allocation2 + $0x2c] sm:$0x1]  ;;  %v2436_v34 = vld [vmem:[#allocation2 + $0x3c] sm:$0xff]  }
  0x53   : > { %2315 = vmatmul.mubr.msk.bf16.vlgmr.msra.gmra.mxu1 %vm640_vm5, %v2430_v43  ;;  %v2875_v14 = vsel %vm2699_vm9, %v2161_v52, %v1321_v39  ;;  %v2879_v15 = vsel %vm2699_vm9, %v1323_v63, %v1324_v7  ;;  %v1842_v16 = vsel %vm653_vm0, %v2195_v19, 0  ;;  %v2884_v18 = vsel %vm2699_vm9, %v2162_v3, %v1328_v61  ;;  %v1567_v19 = vld [vmem:[#allocation2 + $0x30] sm:$0xf]  ;;  %v1772_v24 = vld [vmem:[#allocation2 + $0x24] sm:$0xe] }
  0x54   : > { %2333 = vmatpush3.bf16.msra.mxu1 %v1367_v4  ;;  %2318 = vmatprep.mubr.msk.bf16.mxu1 %vm640_vm5, %v2431_v55  ;;  %v1335_v21 = vrot.slane %v2801_v2, 5  ;;  %v1580_v30 = vor.u32 %v1579_v12, %v1576_v10  ;;  %v1593_v22 = vshll.u32 %v1563_v49, 16  ;;  %v2891_v47 = vsel %vm2699_vm9, %v1330_v35, %v1331_v6  ;;  %v1570_v12 = vld [vmem:[#allocation2 + $0x3c] sm:$0xf] }
  0x55   : > { %2329 = vmatmul.mubr.msk.bf16.gmra.mxu0 %vm640_vm5, %v2155_v62  ;;  %2382 = vmatprep.subr.msk.bf16.mxu1 %vm653_vm0, %v2182_v60  ;;  %v1590_v58 = vor.u32 %v1589_v36, %v2864_v53  ;;  %v1598_v25 = vshrl.u32 %v1564_v40, 16  ;;  %v1601_v26 = vshll.u32 %v1564_v40, 16  ;;  %v2166_v32 = vcombine.low %v2875_v14, %v2879_v15 }
  0x56   : > { %2344 = vmatprep.mubr.msk.bf16.mxu0 %vm640_vm5, %v2433_v1  ;;  %v2191_v33 = vrot.slane %v1771_v17, 9  ;;  %v1791_v38 = vrot.slane %v1789_v57, 4  ;;  %v1792_v2 = vrot.slane %v1563_v49, 5  ;;  %v2163_v27 = vrot.slane %v1299_v20, 9  ;;  %v1773_v49 = vld [vmem:[#allocation2 + $0x30] sm:$0xe] }
  0x57   : > { %v1338_v37 = vrot.slane %v2815_v56, 5  ;;  %v1607_v54 = vshll.u32 %v2887_v23, 16  ;;  %v1611_v39 = vshrl.u32 %v2887_v23, 16  ;;  %v2167_v41 = vcombine.low %v2884_v18, %v2891_v47  ;;  %v1569_v17 = vld [vmem:[#allocation2 + $0x38] sm:$0x1] }
  0x58   : > { %v1337_v43 = vrot.slane %v1335_v21, 4  ;;  %v1581_v44 = vrot.slane %v1580_v30, 4  ;;  %v1595_v50 = vrot.slane %v1593_v22, 5  ;;  %v1591_v48 = vrot.slane %v1590_v58, 4 }
  0x59   : > { %v1600_v4 = vrot.slane %v1598_v25, 4  ;;  %v1603_v56 = vrot.slane %v1601_v26, 5  ;;  %v1622_v55 = vshrl.u32 %v1567_v19, 16  ;;  %v1790_v52 = vsel %vm2699_vm9, %v2191_v33, %v1789_v57 }
  0x5a   : > { %v1793_v31 = vsel %vm2699_vm9, %v1791_v38, %v1792_v2  ;;  %v1625_v61 = vshll.u32 %v1567_v19, 16  ;;  %v1631_v62 = vshll.u32 %v2899_v59, 16  ;;  %v2912_v29 = vrot.slane %v1607_v54, 5  ;;  %v1774_v54 = vld [vmem:[#allocation2 + $0x3c] sm:$0xe] }
  0x5b   : > { %2319 = vmatmul.mubr.msk.bf16.gmra.mxu1 %vm640_vm5, %v2432_v13  ;;  %v1613_v60 = vrot.slane %v1611_v39, 4  ;;  %v1796_v63 = vrot.slane %v2887_v23, 5  ;;  %v1635_v0 = vshrl.u32 %v2899_v59, 16  ;;  %v1336_v1 = vsel %vm2699_vm9, %v2163_v27, %v1335_v21 }
  0x5c   : > { %2334 = vmatprep.mubr.msk.bf16.mxu1 %vm640_vm5, %v2165_v45  ;;  %v1339_v7 = vsel %vm2699_vm9, %v1337_v43, %v1338_v37  ;;  %v1586_v8 = vsel %vm2664_vm8, %v1581_v44, %v2864_v53  ;;  %v1617_v42 = vshll.u32 %v1566_v51, 16  ;;  %v1596_v3 = vsel %vm2664_vm8, %v1591_v48, %v1595_v50  ;;  %v1571_v45 = vld [vmem:[#allocation2 + $0x40] sm:$0xf] }
  0x5d   : > { %2345 = vmatmul.mubr.msk.bf16.vlgmr.msra.gmra.mxu0 %vm640_vm5, %v2434_v46  ;;  %v2196_v6 = vcombine.low %v1790_v52, %v1793_v31  ;;  %v1604_v10 = vor.u32 %v1603_v56, %v1600_v4  ;;  %v1624_v35 = vrot.slane %v1622_v55, 4  ;;  %v1627_v36 = vrot.slane %v1625_v61, 5  ;;  %v1572_v4 = vld [vmem:[#allocation2 + $0x44] sm:$0x1] }
  0x5e   : > { %2363 = vmatpush3.bf16.msra.mxu0 %v1842_v16  ;;  %2348 = vmatprep.mubr.msk.bf16.mxu0 %vm640_vm5, %v2435_v28  ;;  %v2925_v57 = vrot.slane %v1631_v62, 5  ;;  %v1637_v40 = vrot.slane %v1635_v0, 4  ;;  %v1803_v13 = vrot.slane %v2899_v59, 5  ;;  %v1614_v53 = vor.u32 %v1613_v60, %v2912_v29 }
  0x5f   : > { %v2192_v14 = vrot.slane %v1772_v24, 9  ;;  %v1798_v15 = vrot.slane %v1796_v63, 4  ;;  %v1799_v16 = vrot.slane %v1566_v51, 5  ;;  %v2193_v18 = vrot.slane %v1773_v49, 9 }
  0x60   : > { %v1805_v20 = vrot.slane %v1803_v13, 4  ;;  %v1806_v21 = vrot.slane %v1569_v17, 5  ;;  %v1646_v30 = vshrl.u32 %v1570_v12, 16  ;;  %v2168_v22 = vcombine.low %v1336_v1, %v1339_v7 }
  0x61   : > { %v1649_v23 = vshll.u32 %v1570_v12, 16  ;;  %v1655_v46 = vshll.u32 %v1571_v45, 16  ;;  %v1659_v47 = vshrl.u32 %v1571_v45, 16  ;;  %v2183_v58 = vcombine.low %v1586_v8, %v1596_v3 }
  0x62   : > { %v1628_v25 = vor.u32 %v1627_v36, %v1624_v35  ;;  %v1638_v26 = vor.u32 %v1637_v40, %v2925_v57  ;;  %v1641_v28 = vshll.u32 %v1569_v17, 16  ;;  %v1619_v33 = vrot.slane %v1617_v42, 5 }
  0x63   : > { %2335 = vmatmul.mubr.msk.bf16.vlgmr.msra.gmra.mxu1 %vm640_vm5, %v2166_v32  ;;  %v1605_v32 = vrot.slane %v1604_v10, 4  ;;  %v1800_v38 = vsel %vm2699_vm9, %v1798_v15, %v1799_v16  ;;  %v1615_v2 = vrot.slane %v1614_v53, 4  ;;  %v1804_v19 = vsel %vm2699_vm9, %v2193_v18, %v1803_v13 }
  0x64   : > { %2353 = vmatpush3.bf16.msra.mxu1 %v2869_v11  ;;  %2338 = vmatprep.mubr.msk.bf16.mxu1 %vm640_vm5, %v2167_v41  ;;  %v1797_v11 = vsel %vm2699_vm9, %v2192_v14, %v1796_v63  ;;  %v1807_v27 = vsel %vm2699_vm9, %v1805_v20, %v1806_v21  ;;  %v1648_v37 = vrot.slane %v1646_v30, 4  ;;  %v1651_v39 = vrot.slane %v1649_v23, 5 }
  0x65   : > { %2349 = vmatmul.mubr.msk.bf16.gmra.mxu0 %vm640_vm5, %v2436_v34  ;;  %v1657_v59 = vrot.slane %v1655_v46, 5  ;;  %v1661_v41 = vrot.slane %v1659_v47, 4  ;;  %v1810_v43 = vrot.slane %v1571_v45, 5  ;;  %v2197_v44 = vcombine.low %v1797_v11, %v1800_v38 }
  0x66   : > { %2364 = vmatprep.mubr.msk.bf16.mxu0 %vm640_vm5, %v2196_v6  ;;  %v1629_v50 = vrot.slane %v1628_v25, 4  ;;  %v1639_v48 = vrot.slane %v1638_v26, 4  ;;  %v1643_v51 = vrot.slane %v1641_v28, 5  ;;  %v2198_v56 = vcombine.low %v1804_v19, %v1807_v27 }
  0x67   : > { %v2194_v55 = vrot.slane %v1774_v54, 9  ;;  %v1812_v52 = vrot.slane %v1810_v43, 4  ;;  %v1813_v31 = vrot.slane %v1572_v4, 5  ;;  %v1610_v61 = vsel %vm2664_vm8, %v1605_v32, %v2912_v29 }
  0x68   : > { %v1620_v62 = vsel %vm2664_vm8, %v1615_v2, %v1619_v33  ;;  %v1652_v60 = vor.u32 %v1651_v39, %v1648_v37  ;;  %v1662_v63 = vor.u32 %v1661_v41, %v1657_v59  ;;  %v1665_v0 = vshll.u32 %v1572_v4, 16 }
  0x69   : > { %v1634_v1 = vsel %vm2664_vm8, %v1629_v50, %v2925_v57  ;;  %v1644_v7 = vsel %vm2664_vm8, %v1639_v48, %v1643_v51  ;;  %v1811_v29 = vsel %vm2699_vm9, %v2194_v55, %v1810_v43  ;;  %v1814_v8 = vsel %vm2699_vm9, %v1812_v52, %v1813_v31 }
  0x6a   : > { %v2184_v42 = vcombine.low %v1610_v61, %v1620_v62  ;;  %v2185_v24 = vcombine.low %v1634_v1, %v1644_v7  ;;  %v1653_v34 = vrot.slane %v1652_v60, 4  ;;  %v1663_v3 = vrot.slane %v1662_v63, 4 }
  0x6b   : > { %2339 = vmatmul.mubr.msk.bf16.gmra.mxu1 %vm640_vm5, %v2168_v22  ;;  %v1667_v6 = vrot.slane %v1665_v0, 5  ;;  %v2199_v10 = vcombine.low %v1811_v29, %v1814_v8 }
  0x6c   : > { %2354 = vmatprep.mubr.msk.bf16.mxu1 %vm640_vm5, %v2183_v58  ;;  %v1658_v35 = vsel %vm2664_vm8, %v1653_v34, %v1657_v59 }
  0x6d   : > { %2365 = vmatmul.mubr.msk.bf16.vlgmr.msra.gmra.mxu0 %vm640_vm5, %v2197_v44  ;;  %v1668_v49 = vsel %vm2664_vm8, %v1663_v3, %v1667_v6 }
  0x6e   : > { %2368 = vmatprep.mubr.msk.bf16.mxu0 %vm640_vm5, %v2198_v56  ;;  %v2186_v5 = vcombine.low %v1658_v35, %v1668_v49 }
  0x73   : > { %2355 = vmatmul.mubr.msk.bf16.vlgmr.msra.gmra.mxu1 %vm640_vm5, %v2184_v42 }
  0x74   : > { %2358 = vmatprep.mubr.msk.bf16.mxu1 %vm640_vm5, %v2185_v24 }
  0x75   : > { %2369 = vmatmul.mubr.msk.bf16.gmra.mxu0 %vm640_vm5, %v2199_v10 }
  0x7b   : > { %2359 = vmatmul.mubr.msk.bf16.gmra.mxu1 %vm640_vm5, %v2186_v5 }
  0xf5   : > { %v2286_v12 = vpop.f32.mrf.mxu0 }
  0xf7   : > { %v691_v36 = vpop.f32.mrf.mxu0 }
  0xf9   : > { %v2287_v57 = vpop.f32.mrf.mxu0 }
  0xfb   : > { %v2290_v40 = vpop.f32.mrf.mxu1  ;;  %v694_v13 = vpop.f32.mrf.mxu0 }
  0xfd   : > { %v707_v45 = vpop.f32.mrf.mxu1  ;;  %v2306_v53 = vpop.f32.mrf.mxu0 }
  0xff   : > { %v2969_v14 = vpop.f32.mrf.mxu1  ;;  %v928_v15 = vpop.f32.mrf.mxu0 }
 0x101   : > { %v2971_v16 = vpop.f32.mrf.mxu1  ;;  %v2307_v17 = vpop.f32.mrf.mxu0 }
 0x103   : > { %v2296_v9 = vpop.f32.mrf.mxu1  ;;  %v931_v18 = vpop.f32.mrf.mxu0 }
 0x104   : > { %v800_v55 = vadd.f32 %v2296_v9, %v2286_v12 }
 0x105   : > { %v791_v20 = vpop.f32.mrf.mxu1  ;;  %v2310_v21 = vpop.f32.mrf.mxu0 }
 0x106   : > { %v792_v61 = vadd.f32 %v791_v20, %v691_v36  ;;  %v961_v63 = vadd.f32 %v2306_v53, %v800_v55 }
 0x107   : > { %v2297_v30 = vpop.f32.mrf.mxu1  ;;  %v944_v22 = vpop.f32.mrf.mxu0 }
 0x108   : > { %v803_v0 = vadd.f32 %v2297_v30, %v2287_v57  ;;  %v959_v29 = vadd.f32 %v928_v15, %v792_v61 }
 0x109   : > { %v794_v23 = vpop.f32.mrf.mxu1  ;;  %v2973_v46 = vpop.f32.mrf.mxu0 }
 0x10a   : > { %v795_v8 = vadd.f32 %v794_v23, %v694_v13  ;;  %v962_v6 = vadd.f32 %v2307_v17, %v803_v0 }
 0x10b   : > { %v2300_v47 = vpop.f32.mrf.mxu1  ;;  %v2975_v58 = vpop.f32.mrf.mxu0 }
 0x10c   : > { %v816_v24 = vadd.f32 %v2300_v47, %v2290_v40  ;;  %v960_v12 = vadd.f32 %v931_v18, %v795_v8 }
 0x10d   : > { %v807_v25 = vpop.f32.mrf.mxu1  ;;  %v2326_v26 = vpop.f32.mrf.mxu0 }
 0x10e   : > { %v808_v35 = vadd.f32 %v807_v25, %v707_v45  ;;  %v965_v53 = vadd.f32 %v2310_v21, %v816_v24 }
 0x10f   : > { %v2301_v28 = vpop.f32.mrf.mxu1  ;;  %v1257_v32 = vpop.f32.mrf.mxu0 }
 0x110   : > { %v819_v15 = vadd.f32 %v2301_v28, %v2969_v14  ;;  %v963_v17 = vadd.f32 %v944_v22, %v808_v35 }
 0x111   : > { %v810_v33 = vpop.f32.mrf.mxu1  ;;  %v2327_v11 = vpop.f32.mrf.mxu0 }
 0x112   : > { %v811_v23 = vadd.f32 %v810_v33, %v2971_v16 }
 0x113   : > { %v2316_v38 = vpop.f32.mrf.mxu1  ;;  %v1260_v2 = vpop.f32.mrf.mxu0 }
 0x114   : > { %v1080_v42 = vadd.f32 %v2316_v38, %v961_v63 }
 0x115   : > { %v1047_v19 = vpop.f32.mrf.mxu1  ;;  %v2977_v27 = vpop.f32.mrf.mxu0 }
 0x116   : > { %v1078_v10 = vadd.f32 %v1047_v19, %v959_v29  ;;  %v1290_v36 = vadd.f32 %v2326_v26, %v1080_v42  ;;  %v966_v26 = vadd.f32 %v2973_v46, %v819_v15 }
 0x117   : > { %v2317_v37 = vpop.f32.mrf.mxu1  ;;  %v2979_v54 = vpop.f32.mrf.mxu0 }
 0x118   : > { %v1081_v57 = vadd.f32 %v2317_v37, %v962_v6  ;;  %v1288_v9 = vadd.f32 %v1257_v32, %v1078_v10 }
 0x119   : > { %v1050_v39 = vpop.f32.mrf.mxu1  ;;  %v2981_v59 = vpop.f32.mrf.mxu0 }
 0x11a   : > { %v1079_v20 = vadd.f32 %v1050_v39, %v960_v12  ;;  %v1291_v38 = vadd.f32 %v2327_v11, %v1081_v57  ;;  %v964_v39 = vadd.f32 %v2975_v58, %v811_v23 }
 0x11b   : > { %v2320_v41 = vpop.f32.mrf.mxu1  ;;  %v2983_v43 = vpop.f32.mrf.mxu0 }
 0x11c   : > { %v1084_v45 = vadd.f32 %v2320_v41, %v965_v53  ;;  %v1289_v28 = vadd.f32 %v1260_v2, %v1079_v20  ;;  %v2204_v2 = vld [vmem:[%s3056_s4] ss:$0 sm:$0xff] }
 0x11d   : > { %v1063_v44 = vpop.f32.mrf.mxu1  ;;  %v2346_v50 = vpop.f32.mrf.mxu0 }
 0x11e   : > { %v1082_v21 = vadd.f32 %v1063_v44, %v963_v17  ;;  %v1294_v22 = vadd.f32 %v2977_v27, %v1084_v45 }
 0x11f   : > { %v2321_v48 = vpop.f32.mrf.mxu1  ;;  %v1522_v51 = vpop.f32.mrf.mxu0 }
 0x120   : > { %v1085_v55 = vadd.f32 %v2321_v48, %v966_v26  ;;  %v1292_v46 = vadd.f32 %v2979_v54, %v1082_v21 }
 0x121   : > { %v1066_v4 = vpop.f32.mrf.mxu1  ;;  %v2985_v56 = vpop.f32.mrf.mxu0 }
 0x122   : > { %v1083_v44 = vadd.f32 %v1066_v4, %v964_v39  ;;  %v1295_v48 = vadd.f32 %v2981_v59, %v1085_v55 }
 0x123   : > { %v2336_v52 = vpop.f32.mrf.mxu1  ;;  %v2987_v31 = vpop.f32.mrf.mxu0 }
 0x124   : > { %v1436_v30 = vadd.f32 %v2336_v52, %v1290_v36  ;;  %v1293_v29 = vadd.f32 %v2983_v43, %v1083_v44 }
 0x125   : > { %v1403_v62 = vpop.f32.mrf.mxu1  ;;  %v2989_v60 = vpop.f32.mrf.mxu0 }
 0x126   : > { %v1434_v18 = vadd.f32 %v1403_v62, %v1288_v9  ;;  %v1555_v37 = vadd.f32 %v2346_v50, %v1436_v30 }
 0x127   : > { %v2337_v1 = vpop.f32.mrf.mxu1  ;;  %v2992_v7 = vpop.f32.mrf.mxu0 }
 0x128   : > { %v1437_v32 = vadd.f32 %v2337_v1, %v1291_v38  ;;  %v1553_v41 = vadd.f32 %v1522_v51, %v1434_v18 }
 0x129   : > { %v1406_v34 = vpop.f32.mrf.mxu1  ;;  %v2994_v3 = vpop.f32.mrf.mxu0 }
 0x12a   : > { %v1435_v52 = vadd.f32 %v1406_v34, %v1289_v28  ;;  %v1556_v58 = vadd.f32 %v2985_v56, %v1437_v32 }
 0x12b   : > { %v2340_v49 = vpop.f32.mrf.mxu1  ;;  %v2996_v5 = vpop.f32.mrf.mxu0 }
 0x12c   : > { %v1440_v61 = vadd.f32 %v2340_v49, %v1294_v22  ;;  %v1554_v4 = vadd.f32 %v2987_v31, %v1435_v52 }
 0x12d   : > { %v1419_v13 = vpop.f32.mrf.mxu1  ;;  %v2366_v40 = vpop.f32.mrf.mxu0 }
 0x12e   : > { %v1438_v63 = vadd.f32 %v1419_v13, %v1292_v46  ;;  %v1559_v59 = vadd.f32 %v2989_v60, %v1440_v61 }
 0x12f   : > { %v2341_v47 = vpop.f32.mrf.mxu1  ;;  %v1878_v25 = vpop.f32.mrf.mxu0 }
 0x130   : > { %v1441_v42 = vadd.f32 %v2341_v47, %v1295_v48  ;;  %v1557_v10 = vadd.f32 %v2992_v7, %v1438_v63 }
 0x131   : > { %v1422_v19 = vpop.f32.mrf.mxu1  ;;  %v2367_v14 = vpop.f32.mrf.mxu0 }
 0x132   : > { %v1439_v49 = vadd.f32 %v1422_v19, %v1293_v29  ;;  %v1560_v57 = vadd.f32 %v2994_v3, %v1441_v42 }
 0x133   : > { %v2356_v16 = vpop.f32.mrf.mxu1  ;;  %v1881_v33 = vpop.f32.mrf.mxu0 }
 0x134   : > { %v1765_v11 = vadd.f32 %v2356_v16, %v1555_v37  ;;  %v1558_v9 = vadd.f32 %v2996_v5, %v1439_v49 }
 0x135   : > { %v1732_v50 = vpop.f32.mrf.mxu1  ;;  %v2370_v51 = vpop.f32.mrf.mxu0 }
 0x136   : > { %v1911_v62 = vadd.f32 %v2366_v40, %v1765_v11  ;;  %v1763_v27 = vadd.f32 %v1732_v50, %v1553_v41 }
 0x137   : > { %v2357_v54 = vpop.f32.mrf.mxu1  ;;  %v1894_v31 = vpop.f32.mrf.mxu0 }
 0x138   : > { %v1926_v0 = vadd.f32 %v2204_v2, %v1911_v62  ;;  %v1909_v1 = vadd.f32 %v1878_v25, %v1763_v27  ;;  %v1766_v56 = vadd.f32 %v2357_v54, %v1556_v58 }
 0x139   : > { %v1735_v8 = vpop.f32.mrf.mxu1  ;;  %v2371_v40 = vpop.f32.mrf.mxu0 }
 0x13a   : > { %1935 = vst.msk [vmem:[%s3013_s13 + $0x10] sm:$0xff] %vm1932_vm10, %v1926_v0  ;;  %v1924_v24 = vadd.f32 %v2204_v2, %v1909_v1  ;;  %v1912_v34 = vadd.f32 %v2367_v14, %v1766_v56  ;;  %v1764_v6 = vadd.f32 %v1735_v8, %v1554_v4 }
 0x13b   : > { %v2360_v35 = vpop.f32.mrf.mxu1  ;;  %v1897_v25 = vpop.f32.mrf.mxu0 }
 0x13c   : > { %1933 = vst.msk [vmem:[%s3013_s13] sm:$0xff] %vm1932_vm10, %v1924_v24  ;;  %v1927_v12 = vadd.f32 %v2204_v2, %v1912_v34  ;;  %v1910_v43 = vadd.f32 %v1881_v33, %v1764_v6  ;;  %v1769_v60 = vadd.f32 %v2360_v35, %v1559_v59 }
 0x13d   : > { %v1748_v36 = vpop.f32.mrf.mxu1 }
 0x13e   : > { %1936 = vst.msk [vmem:[%s3013_s13 + $0x18] sm:$0xff] %vm1932_vm10, %v1927_v12  ;;  %v1925_v53 = vadd.f32 %v2204_v2, %v1910_v43  ;;  %v1915_v15 = vadd.f32 %v2370_v51, %v1769_v60  ;;  %v1767_v13 = vadd.f32 %v1748_v36, %v1557_v10 }
 0x13f   : > { %v2361_v7 = vpop.f32.mrf.mxu1 }
 0x140   : > { %1934 = vst.msk [vmem:[%s3013_s13 + $0x8] sm:$0xff] %vm1932_vm10, %v1925_v53  ;;  %v1930_v20 = vadd.f32 %v2204_v2, %v1915_v15  ;;  %v1913_v30 = vadd.f32 %v1894_v31, %v1767_v13  ;;  %v1770_v17 = vadd.f32 %v2361_v7, %v1560_v57 }
 0x141   : > { %v1751_v23 = vpop.f32.mrf.mxu1 }
 0x142   : > { %1939 = vst.msk [vmem:[%s3013_s13 + $0x30] sm:$0xff] %vm1932_vm10, %v1930_v20  ;;  %v1928_v3 = vadd.f32 %v2204_v2, %v1913_v30  ;;  %v1916_v45 = vadd.f32 %v2371_v40, %v1770_v17  ;;  %v1768_v47 = vadd.f32 %v1751_v23, %v1558_v9 }
 0x144   : > { %1937 = vst.msk [vmem:[%s3013_s13 + $0x20] sm:$0xff] %vm1932_vm10, %v1928_v3  ;;  %v1931_v38 = vadd.f32 %v2204_v2, %v1916_v45  ;;  %v1914_v18 = vadd.f32 %v1897_v25, %v1768_v47 }
 0x146   : > { %1940 = vst.msk [vmem:[%s3013_s13 + $0x38] sm:$0xff] %vm1932_vm10, %v1931_v38  ;;  %v1929_v5 = vadd.f32 %v2204_v2, %v1914_v18 }
 0x148   : > { %1938 = vst.msk [vmem:[%s3013_s13 + $0x28] sm:$0xff] %vm1932_vm10, %v1929_v5 }
 0x149 PF: > { %s15_s22 = sadd.s32 1, %s2475_s22   ;;  %s3063_s18 = smov %s2467_s20 }
 0x14a   : > { %p12_p10 = scmp.ge.s32.totalorder %s15_s22, 10   ;;  %s3064_s19 = smov %s2471_s21 }
 0x14b   : > { %s3065_s20 = smov %s3068_s23  ;;  %s3066_s21 = smov %s3072_s24 }
 0x14c   :  { %14 = sbr.rel (!%p12_p10) target bundleno = 3 (0x3), region = 88 }

</bundles_post_ra>
